<compile_context>
chip_gen: v5e
topology: v5e:2x2
jax: 0.10.0
libtpu: 0.0.40
codegen_flags: <defaults>
</compile_context>

<pallas_src>
import functools

import jax
import jax.numpy as jnp
from jax.experimental import pallas as pl
from jax.experimental.pallas import tpu as pltpu


# ----------------------------- kernel body -----------------------------------
def _grouped_linear_kernel(x_ref, w_ref, b_ref, o_ref, *, compute_dtype):
    # x_ref: (tile, P*I)   w_ref: (P*I, P*H)   b_ref: (1, P*H) f32   o_ref: (tile, P*H)
    x = x_ref[...].astype(compute_dtype)               # in-VMEM cast (no-op if same dtype)
    acc = jnp.dot(x, w_ref[...], preferred_element_type=jnp.float32)
    o_ref[...] = (acc + b_ref[...]).astype(o_ref.dtype)


# ------------------------- host-side sizing helpers ---------------------------
def _device_kind():
    try:
        return jax.devices()[0].device_kind.lower()
    except Exception:
        return ""


def _mxu_target_lanes():
    # v2-v5 generations have 128x128 MXU tiles; v6e/v7x are 2x256^2.
    kind = _device_kind()
    for old in ("v2", "v3", "v4", "v5"):
        if old in kind:
            return 128
    return 256


def _vmem_limit_bytes():
    # v7x: 64 MiB physical / 32 MiB scoped default per TC -- keep the default.
    # v5e/v6e: 128 MiB physical -- raise the (16/32 MiB) scoped default.
    kind = _device_kind()
    if "7" in kind:
        return None
    return 64 << 20


def _choose_pack(i_dim, h_dim, target_lanes):
    # Pack P rows so K = P*I and N = P*H approach the native MXU tile and the
    # output last dim is lane-dense (>=128 when possible).
    widest = max(i_dim, h_dim)
    return max(1, target_lanes // widest)


def _choose_tile(n_super, packed_i, packed_h, x_bytes, out_bytes, compute_bytes):
    # Estimated VMEM per packed row: double-buffered x & out tiles + in-kernel
    # cast copy + f32 accumulator (with headroom).  ~16 MiB total fits inside
    # every generation's scoped default once vmem_limit is raised (v5e/v6e).
    per_row = (2 * (packed_i * x_bytes + packed_h * out_bytes)
               + packed_i * compute_bytes + 2 * packed_h * 4)
    budget = 16 * 1024 * 1024
    max_rows = max(budget // per_row, 8)
    tile = min(int(max_rows), n_super)
    # Keep >= 2 grid steps when there is enough work so the "parallel" grid
    # axis can shard across both v7x TensorCores.
    if n_super >= 16:
        half = -(-n_super // 2)
        half = -(-half // 8) * 8
        tile = min(tile, half)
    if tile < n_super:
        tile = max(8, (tile // 8) * 8)      # sublane multiple unless full extent
    return tile


# ------------------------------- entry point ----------------------------------
@functools.partial(jax.jit, static_argnames=("groups", "shuffle", "use_bf16", "out_dtype"))
def grouped_linear(x, weight, bias, *, groups: int, shuffle: bool,
                   use_bf16: bool = True, out_dtype=None):
    """x: [..., input_size]; weight: [g, in_per_group, out_per_group]; bias: [g, out_per_group]."""
    *lead, input_size = x.shape
    g, ig, hg = weight.shape
    assert g == groups and input_size == g * ig
    I = g * ig
    H = g * hg
    if g == 1:                      # matches the PyTorch module: no shuffle for 1 group
        shuffle = False

    n = 1
    for d in lead:
        n *= d

    out_dtype = x.dtype if out_dtype is None else out_dtype
    compute_dtype = jnp.bfloat16 if (use_bf16 and x.dtype == jnp.float32) else x.dtype

    # Pack factor: 256-lane target on v6e/v7x bf16, capped at 128 for the exact
    # f32 path (and on 128x128-MXU generations like v5e).
    target = _mxu_target_lanes()
    if not use_bf16:
        target = min(target, 128)
    P = _choose_pack(I, H, target)
    PI, PH = P * I, P * H

    # ---- One-time, parameter-sized preprocessing (could be hoisted to init) ----
    # Block-diagonal weight over the g groups, then fold the channel shuffle
    # (a pure permutation of output channels) into the columns, then replicate
    # block-diagonally P times for the lane packing.
    eye_g = jnp.eye(g, dtype=compute_dtype)
    w_bd = (weight.astype(compute_dtype)[:, :, None, :] * eye_g[:, None, :, None]).reshape(I, H)
    b_flat = bias.reshape(H).astype(jnp.float32)
    if shuffle and g > 1:
        k = jnp.arange(H)
        perm = (k % hg) * g + (k // hg)       # shuffled[k] = original[perm[k]]
        w_bd = w_bd[:, perm]
        b_flat = b_flat[perm]
    eye_p = jnp.eye(P, dtype=compute_dtype)
    w_pk = (eye_p[:, None, :, None] * w_bd[None, :, None, :]).reshape(PI, PH)
    b_pk = jnp.tile(b_flat, P).reshape(1, PH)

    # ---- Activation: flat row view, padded to a multiple of P, lane-packed ----
    x2 = x.reshape(n, I)                       # free metadata reshape
    n_pad = -(-n // P) * P
    if n_pad != n:
        # Pad rows so the lane-packing reshape is legal; the padded rows produce
        # garbage outputs that are sliced off below (no cross-row reduction).
        x2 = jnp.pad(x2, ((0, n_pad - n), (0, 0)))
    n_super = n_pad // P
    xp = x2.reshape(n_super, PI)               # free metadata reshape

    x_bytes = jnp.dtype(x.dtype).itemsize
    o_bytes = jnp.dtype(out_dtype).itemsize
    c_bytes = jnp.dtype(compute_dtype).itemsize
    tile = _choose_tile(n_super, PI, PH, x_bytes, o_bytes, c_bytes)
    grid_n = pl.cdiv(n_super, tile)

    kernel = functools.partial(_grouped_linear_kernel, compute_dtype=compute_dtype)

    cost = pl.CostEstimate(
        flops=2 * n_super * PI * PH,
        transcendentals=0,
        bytes_accessed=(n_pad * I * x_bytes + PI * PH * c_bytes
                        + PH * 4 + n_pad * H * o_bytes),
    )

    cp_kwargs = dict(dimension_semantics=("parallel",))
    vmem_limit = _vmem_limit_bytes()
    if vmem_limit is not None:
        cp_kwargs["vmem_limit_bytes"] = vmem_limit

    out_p = pl.pallas_call(
        kernel,
        out_shape=jax.ShapeDtypeStruct((n_super, PH), out_dtype),
        grid_spec=pltpu.PrefetchScalarGridSpec(
            num_scalar_prefetch=0,
            grid=(grid_n,),
            in_specs=[
                pl.BlockSpec((tile, PI), lambda i: (i, 0)),   # packed row tile of x
                pl.BlockSpec((PI, PH), lambda i: (0, 0)),     # full weight, resident
                pl.BlockSpec((1, PH), lambda i: (0, 0)),      # full bias, resident
            ],
            out_specs=pl.BlockSpec((tile, PH), lambda i: (i, 0)),
        ),
        compiler_params=pltpu.CompilerParams(**cp_kwargs),
        cost_estimate=cost,
    )(xp, w_pk, b_pk)

    out2 = out_p.reshape(n_pad, H)             # free metadata reshape
    if n_pad != n:
        out2 = out2[:n]
    return out2.reshape(*lead, H)


# --------------------------------- reference -----------------------------------
def _reference(x, weight, bias, *, groups: int, shuffle: bool):
    g, ig, hg = weight.shape
    chunks = []
    for i in range(g):
        xi = x[..., i * ig:(i + 1) * ig]
        chunks.append(jnp.dot(xi, weight[i]) + bias[i])
    out = jnp.concatenate(chunks, axis=-1)
    if shuffle and g > 1:
        orig_shape = out.shape
        out = out.reshape(-1, hg, g).swapaxes(-1, -2).reshape(orig_shape)
    return out


if __name__ == "__main__":
    # Small shapes consistent with the module: x of shape [batch, seq, input_size]
    batch, seq = 2, 8
    input_size, hidden_size, groups = 32, 32, 4
    shuffle = True  # groups > 1, so shuffle stays enabled (as in the module)
    ig, hg = input_size // groups, hidden_size // groups

    key = jax.random.PRNGKey(0)
    kx, kw, kb = jax.random.split(key, 3)

    # Deterministic synthetic params matching nn.Linear's default init range
    # U(-1/sqrt(in_per_group), 1/sqrt(in_per_group)).  Weight stored as
    # [groups, in_per_group, out_per_group] (already transposed vs torch's [out, in]).
    bound = 1.0 / (ig ** 0.5)
    weight = jax.random.uniform(kw, (groups, ig, hg), jnp.float32, -bound, bound)
    bias = jax.random.uniform(kb, (groups, hg), jnp.float32, -bound, bound)
    x = jax.random.normal(kx, (batch, seq, input_size), jnp.float32)

    y_ref = _reference(x, weight, bias, groups=groups, shuffle=shuffle)

    # Exact f32 path: must match the module within tolerance.
    y32 = grouped_linear(x, weight, bias, groups=groups, shuffle=shuffle, use_bf16=False)
    y32 = jax.block_until_ready(y32)
    assert y32.shape == (batch, seq, hidden_size)
    assert jnp.allclose(y32, y_ref, atol=1e-5, rtol=1e-5), "f32 path mismatch vs reference"

    # Fast bf16-MXU / f32-accumulate path (recommended on v5e/v6e/v7x).
    y16 = grouped_linear(x, weight, bias, groups=groups, shuffle=shuffle, use_bf16=True)
    y16 = jax.block_until_ready(y16)
    assert y16.shape == (batch, seq, hidden_size)
    assert jnp.allclose(y16, y_ref, atol=5e-2, rtol=5e-2), "bf16 path mismatch vs reference"

    # Odd row count exercises the pad-to-multiple-of-P path.
    x_odd = jax.random.normal(kx, (3, 7, input_size), jnp.float32)
    y_odd = grouped_linear(x_odd, weight, bias, groups=groups, shuffle=shuffle, use_bf16=False)
    y_odd = jax.block_until_ready(y_odd)
    y_odd_ref = _reference(x_odd, weight, bias, groups=groups, shuffle=shuffle)
    assert jnp.allclose(y_odd, y_odd_ref, atol=1e-5, rtol=1e-5), "padded path mismatch vs reference"

    print("KERNEL_OK")
</pallas_src>

<mosaic_0001>
module attributes {stable_mosaic.version = 11 : i64} {
  func.func @_grouped_linear_kernel(%arg0: i32, %arg1: memref<4x128xf32, #tpu.memory_space<vmem>>, %arg2: memref<128x128xf32, #tpu.memory_space<vmem>>, %arg3: memref<1x128xf32, #tpu.memory_space<vmem>>, %arg4: memref<4x128xf32, #tpu.memory_space<vmem>>) attributes {dimension_semantics = [#tpu.dimension_semantics<parallel>], iteration_bounds = array<i64: 1>, scalar_prefetch = 0 : i64, scratch_operands = 0 : i64, tpu.core_type = #tpu.core_type<tc>, window_params = [{transform_indices = @transform_0, window_bounds = array<i64: 4, 128>}, {pipeline_mode = #tpu.pipeline_mode<synchronous>, transform_indices = @transform_1, window_bounds = array<i64: 128, 128>}, {pipeline_mode = #tpu.pipeline_mode<synchronous>, transform_indices = @transform_2, window_bounds = array<i64: 1, 128>}, {transform_indices = @transform_3, window_bounds = array<i64: 4, 128>}]} {
    %c0 = arith.constant 0 : index
    %c0_0 = arith.constant 0 : index
    %0 = vector.load %arg1[%c0, %c0_0] : memref<4x128xf32, #tpu.memory_space<vmem>>, vector<4x128xf32>
    %c0_1 = arith.constant 0 : index
    %c0_2 = arith.constant 0 : index
    %1 = vector.load %arg2[%c0_1, %c0_2] : memref<128x128xf32, #tpu.memory_space<vmem>>, vector<128x128xf32>
    %cst = arith.constant dense<0.000000e+00> : vector<4x128xf32>
    %2 = tpu.matmul %0, %1, %cst {dimension_numbers = #tpu.dot_dimension_numbers<[1], [0], [0], [1], [0, 0, 1, 1], [], []>} : vector<4x128xf32>, vector<128x128xf32>, vector<4x128xf32> -> vector<4x128xf32>
    %c0_3 = arith.constant 0 : index
    %c0_4 = arith.constant 0 : index
    %3 = vector.load %arg3[%c0_3, %c0_4] : memref<1x128xf32, #tpu.memory_space<vmem>>, vector<1x128xf32>
    %4 = vector.broadcast %3 : vector<1x128xf32> to vector<4x128xf32>
    %5 = arith.addf %2, %4 : vector<4x128xf32>
    %c0_5 = arith.constant 0 : index
    %c0_6 = arith.constant 0 : index
    %6 = vector.load %arg4[%c0_5, %c0_6] : memref<4x128xf32, #tpu.memory_space<vmem>>, vector<4x128xf32>
    tpu.vector_store %arg4[%c0_5, %c0_6], %5 {strides = array<i32>} : memref<4x128xf32, #tpu.memory_space<vmem>>, vector<4x128xf32>,
    return
  }
  func.func @transform_0(%arg0: i32) -> (i32, i32) {
    %c0_i32 = arith.constant 0 : i32
    %c0_i32_0 = arith.constant 0 : i32
    return %arg0, %c0_i32 : i32, i32
  }
  func.func @transform_1(%arg0: i32) -> (i32, i32) {
    %c0_i32 = arith.constant 0 : i32
    %c0_i32_0 = arith.constant 0 : i32
    %c0_i32_1 = arith.constant 0 : i32
    return %c0_i32, %c0_i32_0 : i32, i32
  }
  func.func @transform_2(%arg0: i32) -> (i32, i32) {
    %c0_i32 = arith.constant 0 : i32
    %c0_i32_0 = arith.constant 0 : i32
    %c0_i32_1 = arith.constant 0 : i32
    return %c0_i32, %c0_i32_0 : i32, i32
  }
  func.func @transform_3(%arg0: i32) -> (i32, i32) {
    %c0_i32 = arith.constant 0 : i32
    %c0_i32_0 = arith.constant 0 : i32
    return %arg0, %c0_i32 : i32, i32
  }
}

</mosaic_0001>

<bundles_post_ra>
// kernel: tile.8
= control target key start
LH: loop header
LB: loop body
LE: loop exit
PB: predicated region body
PF: predicated region fallthrough
CT: control target
= control target key end

     0   :  { %s22_s0 = inlined_call_operand.vmem [shape: f32[32], index: 0, kind: input, shape index: {}]   ;;  %s23_s1 = inlined_call_operand.vmem [shape: f32[4,32], index: 1, kind: output, shape index: {}]  }
   0x1   :  { %v4_v0 = vld [vmem:[%s22_s0] ss:$0 sm:$0xff] }
   0x2   :  { %5 = vst [vmem:[%s23_s1] sm:$0xf] %v4_v0 }

// kernel: tile.9
= control target key start
LH: loop header
LB: loop body
LE: loop exit
PB: predicated region body
PF: predicated region fallthrough
CT: control target
= control target key end

     0   :  { %s37_s8 = smov 32   ;;  %s38_s9 = smov 64   ;;  %vm7_vm0 = vcmask 261120   ;;  %vm13_vm1 = vcmask 1048320   ;;  %vm19_vm2 = vcmask 785920   ;;  %vm25_vm3 = vcmask 523520   ;;  %s55_s0 = inlined_call_operand.vmem [shape: f32[4,32], index: 0, kind: input, shape index: {}]   ;;  %s56_s1 = inlined_call_operand.vmem [shape: f32[1,128], index: 1, kind: output, shape index: {}]  }
   0x1   :  { %v4_v0 = vld [vmem:[%s55_s0] sm:$0xf]  ;;  %s36_s0 = smov 96  }
   0x2   :  { %5 = vst [vmem:[#allocation1] sm:$0xf] %v4_v0 }
   0x9   :  { %v10_v1 = vld [vmem:[#allocation1 + $0x3] sm:$0x1]   ;;  %v22_v2 = vld [vmem:[#allocation1 + $0x1] sm:$0x1]   ;;  %v16_v3 = vld [vmem:[#allocation1 + $0x2] sm:$0x1]  }
   0xa   :  { %11 = vrot.lane.b32.xlu0 %v10_v1, %s36_s0  ;;  %23 = vrot.lane.b32.xlu1 %v22_v2, %s37_s8  ;;  %v6_v4 = vld [vmem:[#allocation1] sm:$0x1]  }
   0xb   :  { %8 = vst.msk [vmem:[#allocation0] sm:$0x1] %vm7_vm0, %v6_v4  }
  0x12   :  { %17 = vrot.lane.b32.xlu0 %v16_v3, %s38_s9 }
  0x7c   :  { %v12_v5 = vpop.permute.xlu0 %11   ;;  %v24_v6 = vpop.permute.xlu1 %23  }
  0x7d   :  { %14 = vst.msk [vmem:[#allocation0] sm:$0x1] %vm13_vm1, %v12_v5  }
  0x84   :  { %v18_v7 = vpop.permute.xlu0 %17  }
  0x85   :  { %20 = vst.msk [vmem:[#allocation0] sm:$0x1] %vm19_vm2, %v18_v7  }
  0x86   :  { %26 = vst.msk [vmem:[#allocation0] sm:$0x1] %vm25_vm3, %v24_v6  }
  0x8d   :  { %v29_v8 = vld [vmem:[#allocation0] sm:$0x1] }
  0x8e   :  { %32 = vst [vmem:[%s56_s1] sm:$0x1] %v29_v8 }

// kernel: grouped_linear.1
= control target key start
LH: loop header
LB: loop body
LE: loop exit
PB: predicated region body
PF: predicated region fallthrough
CT: control target
= control target key end

     0   :  { %s138_s1 = inlined_call_operand.vmem [shape: f32[128,128], index: 1, kind: input, shape index: {}]   ;;  %s139_s2 = inlined_call_operand.vmem [shape: f32[1,128], index: 2, kind: input, shape index: {}]   ;;  %s140_s0 = inlined_call_operand.vmem [shape: f32[4,128], index: 0, kind: input, shape index: {}]   ;;  %s141_s3 = inlined_call_operand.vmem [shape: f32[4,128], index: 3, kind: output, shape index: {}]  }
   0x1   :  { %v30_v0 = vld [vmem:[%s138_s1 + $0x78] sm:$0xff]  ;;  %v29_v1 = vld [vmem:[%s138_s1 + $0x70] sm:$0xff]  ;;  %v28_v2 = vld [vmem:[%s138_s1 + $0x68] sm:$0xff] }
   0x2   :  { %35 = vmatpush.msra.mxu0 %v30_v0  ;;  %v27_v3 = vld [vmem:[%s138_s1 + $0x60] sm:$0xff]  ;;  %v26_v4 = vld [vmem:[%s138_s1 + $0x58] sm:$0xff]  ;;  %v25_v5 = vld [vmem:[%s138_s1 + $0x50] sm:$0xff] }
   0x3   :  { %v24_v6 = vld [vmem:[%s138_s1 + $0x48] sm:$0xff]  ;;  %v23_v7 = vld [vmem:[%s138_s1 + $0x40] sm:$0xff]  ;;  %v22_v8 = vld [vmem:[%s138_s1 + $0x38] sm:$0xff] }
   0x4   :  { %36 = vmatpush.msra.mxu0 %v29_v1  ;;  %v21_v9 = vld [vmem:[%s138_s1 + $0x30] sm:$0xff]  ;;  %v20_v10 = vld [vmem:[%s138_s1 + $0x28] sm:$0xff]  ;;  %v19_v11 = vld [vmem:[%s138_s1 + $0x20] sm:$0xff] }
   0x5   :  { %v18_v12 = vld [vmem:[%s138_s1 + $0x18] sm:$0xff]  ;;  %v17_v13 = vld [vmem:[%s138_s1 + $0x10] sm:$0xff]  ;;  %v16_v14 = vld [vmem:[%s138_s1 + $0x8] sm:$0xff] }
   0x6   :  { %37 = vmatpush.msra.mxu0 %v28_v2  ;;  %v15_v15 = vld [vmem:[%s138_s1] sm:$0xff] }
   0x7   :  { %v14_v16 = vld [vmem:[%s140_s0] sm:$0xf] }
   0x8   :  { %38 = vmatpush.msra.mxu0 %v27_v3  ;;  %v60_v17 = vld [vmem:[%s139_s2] ss:$0 sm:$0xff] }
   0xa   :  { %39 = vmatpush.msra.mxu0 %v26_v4 }
   0xc   :  { %40 = vmatpush.msra.mxu0 %v25_v5 }
   0xe   :  { %41 = vmatpush.msra.mxu0 %v24_v6 }
  0x10   :  { %42 = vmatpush.msra.mxu0 %v23_v7 }
  0x12   :  { %43 = vmatpush.msra.mxu0 %v22_v8 }
  0x14   :  { %44 = vmatpush.msra.mxu0 %v21_v9 }
  0x16   :  { %45 = vmatpush.msra.mxu0 %v20_v10 }
  0x18   :  { %46 = vmatpush.msra.mxu0 %v19_v11 }
  0x1a   :  { %47 = vmatpush.msra.mxu0 %v18_v12 }
  0x1c   :  { %48 = vmatpush.msra.mxu0 %v17_v13 }
  0x1e   :  { %49 = vmatpush.msra.mxu0 %v16_v14 }
  0x20   :  { %50 = vmatpush.msra.mxu0 %v15_v15 }
  0x21   :  { %51 = vmatmul.f32.vlgmr.msra.gmra.mxu0 %v14_v16 }
  0x9e   :  { %v52_v18 = vpop.f32.mrf.mxu0 }
  0x9f   :  { %v53_v19 = vadd.f32 %v60_v17, %v52_v18 }
  0xa1   :  { %55 = vst [vmem:[%s141_s3] sm:$0xf] %v53_v19 }

</bundles_post_ra>
